<compile_context>
chip_gen: v5e
topology: v5e:2x2
jax: 0.10.0
libtpu: 0.0.40
codegen_flags: <defaults>
</compile_context>

<pallas_src>
import functools

import jax
import jax.numpy as jnp
from jax.experimental import pallas as pl
from jax.experimental.pallas import tpu as pltpu


def _round_up(n: int, m: int) -> int:
    return (n + m - 1) // m * m


def _round_down(n: int, m: int) -> int:
    return max(m, n // m * m)


# --------------------------------------------------------------------------- #
# Kernel
# --------------------------------------------------------------------------- #
def encoder_kernel(x_ref, w1_ref, b1_ref, w2_ref, b2_ref, o_ref):
    # Cast x to the MXU compute dtype *inside* the kernel (no extra HBM copy).
    x = x_ref[...]
    if x.dtype != w1_ref.dtype:
        x = x.astype(w1_ref.dtype)
    # Linear 1 (MXU, f32 accumulation) + bias + ReLU (VPU)
    h = jnp.dot(x, w1_ref[...], preferred_element_type=jnp.float32)
    h = jnp.maximum(h + b1_ref[...].astype(jnp.float32), 0.0)
    # Linear 2 (cast activation back to the weight dtype for the MXU)
    o = jnp.dot(h.astype(w2_ref.dtype), w2_ref[...],
                preferred_element_type=jnp.float32)
    o_ref[...] = (o + b2_ref[...].astype(jnp.float32)).astype(o_ref.dtype)


# --------------------------------------------------------------------------- #
# Generation / VMEM aware tiling
# --------------------------------------------------------------------------- #
@functools.lru_cache(maxsize=None)
def _tpu_topology():
    """(physical VMEM bytes, TensorCores sharing 'parallel' grid axes)."""
    phys_vmem = 64 << 20          # conservative default (v7x per-TC VMEM)
    num_cores = 1
    try:
        info = pltpu.get_tpu_info()
        phys_vmem = int(getattr(info, "vmem_capacity_bytes", phys_vmem))
    except Exception:
        pass
    try:
        kind = jax.devices()[0].device_kind.lower()
        if any(t in kind for t in ("v7", "v5p", "v4")):
            num_cores = 2
    except Exception:
        pass
    return phys_vmem, num_cores


def _tile_vmem_bytes(tm, d, h1, h2, x_bytes, w_bytes, out_bytes):
    weights = (d * h1 + h1 * h2) * w_bytes + (h1 + h2) * 4
    io = 2 * tm * d * x_bytes + 2 * tm * h2 * out_bytes   # double-buffered I/O
    scratch = tm * (h1 + h2) * 4                          # f32 intermediates
    return weights + io + scratch


def _choose_tile(B, d, h1, h2, x_bytes, w_bytes, out_bytes, tm_req,
                 phys_vmem, num_cores):
    tm = max(8, _round_up(tm_req, 8))
    if num_cores >= 2:
        # >= 4 grid steps (2 per TensorCore) so both cores double-buffer.
        tm = min(tm, max(8, _round_up(pl.cdiv(B, 4), 8)))
    # else: single TC -> keep big lane-dense tiles; >=3 steps happen naturally
    # for large B, otherwise one/two big steps (don't shrink just to add steps).
    if B >= 8:
        tm = min(tm, _round_down(B, 8))   # never tile wider than the batch
    tm = max(8, tm)
    # VMEM-aware cap (leave headroom for compiler-internal scratch).
    budget = int(phys_vmem * 0.8)
    while tm > 8 and _tile_vmem_bytes(tm, d, h1, h2,
                                      x_bytes, w_bytes, out_bytes) > budget:
        tm = _round_down(tm // 2, 8)
    return tm, _tile_vmem_bytes(tm, d, h1, h2, x_bytes, w_bytes, out_bytes)


# --------------------------------------------------------------------------- #
# Forward wrapper
# --------------------------------------------------------------------------- #
def encoder_forward(x, w1, b1, w2, b2, *, tm=512, out_dtype=None):
    """Fused Linear -> ReLU -> Linear.

    The MXU compute dtype is the dtype of w1/w2 (x is cast in-kernel; use
    `cast_params_for_mxu` once to get a bf16 weight copy).  Accumulation is
    always f32.  `out_dtype` defaults to x.dtype; pass jnp.bfloat16 to halve
    the output writeback traffic.  Ragged batches are handled by letting the
    last grid block overhang (no padding copy).
    """
    B, d = x.shape
    h1 = w1.shape[1]
    h2 = w2.shape[1]
    out_dtype = jnp.dtype(out_dtype) if out_dtype is not None else x.dtype

    phys_vmem, num_cores = _tpu_topology()
    tm_eff, vmem_need = _choose_tile(
        B, d, h1, h2,
        x.dtype.itemsize, w1.dtype.itemsize, jnp.dtype(out_dtype).itemsize,
        tm, phys_vmem, num_cores)
    grid = (pl.cdiv(B, tm_eff),)

    cost = pl.CostEstimate(
        flops=2 * B * (d * h1 + h1 * h2),
        transcendentals=0,
        bytes_accessed=(x.size * x.dtype.itemsize
                        + w1.size * w1.dtype.itemsize
                        + w2.size * w2.dtype.itemsize
                        + b1.size * b1.dtype.itemsize
                        + b2.size * b2.dtype.itemsize
                        + B * h2 * jnp.dtype(out_dtype).itemsize),
    )

    return pl.pallas_call(
        encoder_kernel,
        out_shape=jax.ShapeDtypeStruct((B, h2), out_dtype),
        grid_spec=pltpu.PrefetchScalarGridSpec(
            num_scalar_prefetch=0,
            grid=grid,
            in_specs=[
                pl.BlockSpec((tm_eff, d), lambda i: (i, 0)),   # x tile (batch)
                pl.BlockSpec((d, h1), lambda i: (0, 0)),       # W1 (resident)
                pl.BlockSpec((1, h1), lambda i: (0, 0)),       # b1 (resident)
                pl.BlockSpec((h1, h2), lambda i: (0, 0)),      # W2 (resident)
                pl.BlockSpec((1, h2), lambda i: (0, 0)),       # b2 (resident)
            ],
            out_specs=pl.BlockSpec((tm_eff, h2), lambda i: (i, 0)),  # lane-dense
        ),
        compiler_params=pltpu.CompilerParams(
            dimension_semantics=("parallel",),
            vmem_limit_bytes=int(min(phys_vmem,
                                     max(32 << 20, vmem_need + (8 << 20)))),
        ),
        cost_estimate=cost,
    )(x, w1, b1, w2, b2)


def cast_params_for_mxu(params, compute_dtype=jnp.bfloat16):
    """One-time (hoisted) cast: weights -> compute_dtype for the MXU, biases -> f32.

    Explicit opt-in: the bf16 operand path changes numerics vs the f32 PyTorch
    Encoder (fine for VIME pretraining, relaxed tolerance in the check below).
    """
    return [(w.astype(compute_dtype), b.astype(jnp.float32)) for (w, b) in params]


# --------------------------------------------------------------------------- #
# Reference + init (mimics nn.Linear default init)
# --------------------------------------------------------------------------- #
def init_params(key, d, hidden_dims=(128, 128), dtype=jnp.float32):
    dims = [d, *hidden_dims]
    params = []
    for i in range(len(dims) - 1):
        fan_in, fan_out = dims[i], dims[i + 1]
        key, kw, kb = jax.random.split(key, 3)
        bound = 1.0 / (fan_in ** 0.5)
        w = jax.random.uniform(kw, (fan_in, fan_out), dtype, -bound, bound)
        b = jax.random.uniform(kb, (1, fan_out), dtype, -bound, bound)
        params.append((w, b))
    return params


def encoder_reference(x, params):
    (w1, b1), (w2, b2) = params
    h = jnp.maximum(x @ w1 + b1, 0.0)
    return h @ w2 + b2


if __name__ == "__main__":
    key = jax.random.PRNGKey(0)
    B, d = 64, 16
    hidden_dims = (128, 128)

    kx, kp = jax.random.split(key)
    x = jax.random.normal(kx, (B, d), jnp.float32)
    params = init_params(kp, d, hidden_dims)
    (w1, b1), (w2, b2) = params
    ref = encoder_reference(x, params)

    # 1) Pure f32 data path: matches the PyTorch-equivalent reference tightly.
    out_f32 = jax.block_until_ready(encoder_forward(x, w1, b1, w2, b2))
    assert out_f32.shape == (B, hidden_dims[-1])
    assert jnp.allclose(out_f32, ref, atol=1e-5, rtol=1e-5), "f32 path mismatch"

    # 2) bf16 MXU operands (weights pre-cast once; x cast in-kernel), f32 output.
    (w1b, b1b), (w2b, b2b) = cast_params_for_mxu(params)
    out_bf = jax.block_until_ready(encoder_forward(x, w1b, b1b, w2b, b2b))
    assert out_bf.shape == (B, hidden_dims[-1]) and out_bf.dtype == x.dtype
    assert jnp.allclose(out_bf, ref, atol=3e-2, rtol=3e-2), "bf16 operand mismatch"

    # 3) bf16 output writeback (halves the dominant HBM traffic when d is small).
    out_bfo = jax.block_until_ready(
        encoder_forward(x, w1b, b1b, w2b, b2b, out_dtype=jnp.bfloat16))
    assert out_bfo.dtype == jnp.bfloat16
    assert jnp.allclose(out_bfo.astype(jnp.float32), ref,
                        atol=5e-2, rtol=5e-2), "bf16 output mismatch"

    # 4) Ragged batch: no wrapper pad; last grid block overhangs and Pallas
    #    masks the out-of-bounds output rows.
    Br = 70
    xr = jax.random.normal(jax.random.PRNGKey(1), (Br, d), jnp.float32)
    refr = encoder_reference(xr, params)
    outr = jax.block_until_ready(encoder_forward(xr, w1, b1, w2, b2))
    assert outr.shape == (Br, hidden_dims[-1])
    assert jnp.allclose(outr, refr, atol=1e-5, rtol=1e-5), "ragged batch mismatch"

    print("KERNEL_OK")
</pallas_src>

<mosaic_0001>
module attributes {stable_mosaic.version = 11 : i64} {
  func.func @encoder_kernel(%arg0: i32, %arg1: memref<64x16xf32, #tpu.memory_space<vmem>>, %arg2: memref<16x128xf32, #tpu.memory_space<vmem>>, %arg3: memref<1x128xf32, #tpu.memory_space<vmem>>, %arg4: memref<128x128xf32, #tpu.memory_space<vmem>>, %arg5: memref<1x128xf32, #tpu.memory_space<vmem>>, %arg6: memref<64x128xf32, #tpu.memory_space<vmem>>) attributes {dimension_semantics = [#tpu.dimension_semantics<parallel>], iteration_bounds = array<i64: 1>, scalar_prefetch = 0 : i64, scratch_operands = 0 : i64, tpu.core_type = #tpu.core_type<tc>, window_params = [{transform_indices = @transform_0, window_bounds = array<i64: 64, 16>}, {pipeline_mode = #tpu.pipeline_mode<synchronous>, transform_indices = @transform_1, window_bounds = array<i64: 16, 128>}, {pipeline_mode = #tpu.pipeline_mode<synchronous>, transform_indices = @transform_2, window_bounds = array<i64: 1, 128>}, {pipeline_mode = #tpu.pipeline_mode<synchronous>, transform_indices = @transform_3, window_bounds = array<i64: 128, 128>}, {pipeline_mode = #tpu.pipeline_mode<synchronous>, transform_indices = @transform_4, window_bounds = array<i64: 1, 128>}, {transform_indices = @transform_5, window_bounds = array<i64: 64, 128>}]} {
    %c0 = arith.constant 0 : index
    %c0_0 = arith.constant 0 : index
    %0 = vector.load %arg1[%c0, %c0_0] : memref<64x16xf32, #tpu.memory_space<vmem>>, vector<64x16xf32>
    %c0_1 = arith.constant 0 : index
    %c0_2 = arith.constant 0 : index
    %1 = vector.load %arg2[%c0_1, %c0_2] : memref<16x128xf32, #tpu.memory_space<vmem>>, vector<16x128xf32>
    %cst = arith.constant dense<0.000000e+00> : vector<64x128xf32>
    %2 = tpu.matmul %0, %1, %cst {dimension_numbers = #tpu.dot_dimension_numbers<[1], [0], [0], [1], [0, 0, 1, 1], [], []>} : vector<64x16xf32>, vector<16x128xf32>, vector<64x128xf32> -> vector<64x128xf32>
    %c0_3 = arith.constant 0 : index
    %c0_4 = arith.constant 0 : index
    %3 = vector.load %arg3[%c0_3, %c0_4] : memref<1x128xf32, #tpu.memory_space<vmem>>, vector<1x128xf32>
    %4 = vector.broadcast %3 : vector<1x128xf32> to vector<64x128xf32>
    %5 = arith.addf %2, %4 : vector<64x128xf32>
    %cst_5 = arith.constant 0.000000e+00 : f32
    %6 = vector.broadcast %cst_5 : f32 to vector<64x128xf32>
    %7 = arith.maximumf %5, %6 : vector<64x128xf32>
    %c0_6 = arith.constant 0 : index
    %c0_7 = arith.constant 0 : index
    %8 = vector.load %arg4[%c0_6, %c0_7] : memref<128x128xf32, #tpu.memory_space<vmem>>, vector<128x128xf32>
    %cst_8 = arith.constant dense<0.000000e+00> : vector<64x128xf32>
    %9 = tpu.matmul %7, %8, %cst_8 {dimension_numbers = #tpu.dot_dimension_numbers<[1], [0], [0], [1], [0, 0, 1, 1], [], []>} : vector<64x128xf32>, vector<128x128xf32>, vector<64x128xf32> -> vector<64x128xf32>
    %c0_9 = arith.constant 0 : index
    %c0_10 = arith.constant 0 : index
    %10 = vector.load %arg5[%c0_9, %c0_10] : memref<1x128xf32, #tpu.memory_space<vmem>>, vector<1x128xf32>
    %11 = vector.broadcast %10 : vector<1x128xf32> to vector<64x128xf32>
    %12 = arith.addf %9, %11 : vector<64x128xf32>
    %c0_11 = arith.constant 0 : index
    %c0_12 = arith.constant 0 : index
    %13 = vector.load %arg6[%c0_11, %c0_12] : memref<64x128xf32, #tpu.memory_space<vmem>>, vector<64x128xf32>
    tpu.vector_store %arg6[%c0_11, %c0_12], %12 {strides = array<i32>} : memref<64x128xf32, #tpu.memory_space<vmem>>, vector<64x128xf32>,
    return
  }
  func.func @transform_0(%arg0: i32) -> (i32, i32) {
    %c0_i32 = arith.constant 0 : i32
    %c0_i32_0 = arith.constant 0 : i32
    return %arg0, %c0_i32 : i32, i32
  }
  func.func @transform_1(%arg0: i32) -> (i32, i32) {
    %c0_i32 = arith.constant 0 : i32
    %c0_i32_0 = arith.constant 0 : i32
    %c0_i32_1 = arith.constant 0 : i32
    return %c0_i32, %c0_i32_0 : i32, i32
  }
  func.func @transform_2(%arg0: i32) -> (i32, i32) {
    %c0_i32 = arith.constant 0 : i32
    %c0_i32_0 = arith.constant 0 : i32
    %c0_i32_1 = arith.constant 0 : i32
    return %c0_i32, %c0_i32_0 : i32, i32
  }
  func.func @transform_3(%arg0: i32) -> (i32, i32) {
    %c0_i32 = arith.constant 0 : i32
    %c0_i32_0 = arith.constant 0 : i32
    %c0_i32_1 = arith.constant 0 : i32
    return %c0_i32, %c0_i32_0 : i32, i32
  }
  func.func @transform_4(%arg0: i32) -> (i32, i32) {
    %c0_i32 = arith.constant 0 : i32
    %c0_i32_0 = arith.constant 0 : i32
    %c0_i32_1 = arith.constant 0 : i32
    return %c0_i32, %c0_i32_0 : i32, i32
  }
  func.func @transform_5(%arg0: i32) -> (i32, i32) {
    %c0_i32 = arith.constant 0 : i32
    %c0_i32_0 = arith.constant 0 : i32
    return %arg0, %c0_i32 : i32, i32
  }
}

</mosaic_0001>

<bundles_post_ra>
// kernel: tpu_custom_call.1
= control target key start
LH: loop header
LB: loop body
LE: loop exit
PB: predicated region body
PF: predicated region fallthrough
CT: control target
= control target key end

     0   :  { %10 = vsyncpa [#allocation3], 0  ;;  %s401_s0 = inlined_call_operand.vmem [shape: f32[64,16], index: 0, kind: input, shape index: {}]   ;;  %s402_s1 = inlined_call_operand.vmem [shape: f32[16,128], index: 1, kind: input, shape index: {}]   ;;  %s403_s2 = inlined_call_operand.vmem [shape: f32[1,128], index: 2, kind: input, shape index: {}]   ;;  %s404_s3 = inlined_call_operand.hbm [shape: f32[128,128], index: 3, kind: input, shape index: {}]   ;;  %s405_s4 = inlined_call_operand.vmem [shape: f32[1,128], index: 4, kind: input, shape index: {}]   ;;  %s406_s5 = inlined_call_operand.hbm [shape: f32[64,128], index: 5, kind: output, shape index: {}]  }
   0x1   :  { %11 = vsyncpa [#allocation4], 0  ;;  %s22_s20 = sshll.u32 %s404_s3, 4  ;;  %s311_s21 = smov [#allocation2]   ;;  %s23_s20 = int_to_ptr.hbm [resolvable:$true] %s22_s20 }
   0x2   :  { %s24_s22 = sshll.u32 %s311_s21, 4  ;;  %s312_s23 = smov 128   ;;  %s25_s22 = int_to_ptr.vmem [resolvable:$true] %s24_s22 }
   0x3   :  { %s313_s24 = smov 8  }
   0x4   :  { %30 = dma.hbm_to_vmem [thread:$0]  %s23_s20, 2048, %s25_s22, [#allocation3], %s312_s23, %s312_s23, %s313_s24  }
   0x5   :  { %307 = dma.done.wait [#allocation3], 2048  }
   0x6   :  { %308 = vsyncadd [#allocation3], 4294965248  ;;  %v46_v0 = vld [vmem:[%s402_s1 + $0x8] sm:$0xff]  ;;  %v45_v1 = vld [vmem:[%s402_s1] sm:$0xff]  ;;  %vm51_vm0 = vcmask 130048   ;;  %s200_s25 = sshll.u32 %s406_s5, 4  ;;  %s201_s25 = int_to_ptr.hbm [resolvable:$true] %s200_s25 }
   0x7   :  { %90 = vmatpush.msra.mxu0 %v46_v0  ;;  %v37_v2 = vld [vmem:[%s401_s0] sm:$0xff]  ;;  %v38_v3 = vld [vmem:[%s401_s0 + $0x8] sm:$0xff]  ;;  %v39_v4 = vld [vmem:[%s401_s0 + $0x10] sm:$0xff] }
   0x8   :  { %v40_v5 = vld [vmem:[%s401_s0 + $0x18] sm:$0xff]  ;;  %v139_v7 = vld [vmem:[#allocation2 + $0x70] sm:$0xff]  ;;  %v138_v8 = vld [vmem:[#allocation2 + $0x68] sm:$0xff] }
   0x9   :  { %91 = vmatpush.msra.mxu0 %v45_v1  ;;  %v140_v6 = vld [vmem:[#allocation2 + $0x78] sm:$0xff]  ;;  %v137_v9 = vld [vmem:[#allocation2 + $0x60] sm:$0xff]  ;;  %v135_v12 = vld [vmem:[#allocation2 + $0x50] sm:$0xff] }
   0xa   :  { %213 = vmatmul.msk.f32.vlgmr.msra.gmra.mxu0 %vm51_vm0, %v37_v2  ;;  %145 = vmatpush.msra.mxu1 %v140_v6  ;;  %v41_v10 = vld [vmem:[%s401_s0 + $0x20] sm:$0xff]  ;;  %v136_v11 = vld [vmem:[#allocation2 + $0x58] sm:$0xff]  ;;  %v134_v13 = vld [vmem:[#allocation2 + $0x48] sm:$0xff] }
   0xb   :  { %221 = vmatpush.msra.mxu2 %v140_v6  ;;  %222 = vmatpush.msra.mxu3 %v140_v6  ;;  %v133_v14 = vld [vmem:[#allocation2 + $0x40] sm:$0xff]  ;;  %v42_v15 = vld [vmem:[%s401_s0 + $0x28] sm:$0xff]  ;;  %v132_v16 = vld [vmem:[#allocation2 + $0x38] sm:$0xff] }
   0xc   :  { %146 = vmatpush.msra.mxu1 %v139_v7  ;;  %v131_v17 = vld [vmem:[#allocation2 + $0x30] sm:$0xff]  ;;  %v130_v18 = vld [vmem:[#allocation2 + $0x28] sm:$0xff]  ;;  %v129_v19 = vld [vmem:[#allocation2 + $0x20] sm:$0xff] }
   0xd   :  { %223 = vmatpush.msra.mxu2 %v139_v7  ;;  %224 = vmatpush.msra.mxu3 %v139_v7  ;;  %v43_v20 = vld [vmem:[%s401_s0 + $0x30] sm:$0xff]  ;;  %v128_v21 = vld [vmem:[#allocation2 + $0x18] sm:$0xff]  ;;  %v126_v24 = vld [vmem:[#allocation2 + $0x8] sm:$0xff] }
   0xe   :  { %147 = vmatpush.msra.mxu1 %v138_v8  ;;  %v44_v22 = vld [vmem:[%s401_s0 + $0x38] sm:$0xff]  ;;  %v127_v23 = vld [vmem:[#allocation2 + $0x10] sm:$0xff]  ;;  %v125_v25 = vld [vmem:[#allocation2] sm:$0xff] }
   0xf   :  { %225 = vmatpush.msra.mxu2 %v138_v8  ;;  %226 = vmatpush.msra.mxu3 %v138_v8  ;;  %v257_v26 = vld [vmem:[%s403_s2] ss:$0 sm:$0xff] }
  0x10   :  { %148 = vmatpush.msra.mxu1 %v137_v9  ;;  %v258_v51 = vld [vmem:[%s405_s4] ss:$0 sm:$0xff]  ;;  %s314_s4 = smov [#allocation5]  }
  0x11   :  { %227 = vmatpush.msra.mxu2 %v137_v9  ;;  %228 = vmatpush.msra.mxu3 %v137_v9  ;;  %s198_s20 = sshll.u32 %s314_s4, 4  ;;  %s199_s20 = int_to_ptr.vmem [resolvable:$true] %s198_s20 }
  0x12   :  { %214 = vmatmul.msk.f32.gmra.mxu0 %vm51_vm0, %v38_v3  ;;  %149 = vmatpush.msra.mxu1 %v136_v11 }
  0x13   :  { %229 = vmatpush.msra.mxu2 %v136_v11  ;;  %230 = vmatpush.msra.mxu3 %v136_v11 }
  0x14   :  { %150 = vmatpush.msra.mxu1 %v135_v12 }
  0x15   :  { %231 = vmatpush.msra.mxu2 %v135_v12  ;;  %232 = vmatpush.msra.mxu3 %v135_v12 }
  0x16   :  { %151 = vmatpush.msra.mxu1 %v134_v13 }
  0x17   :  { %233 = vmatpush.msra.mxu2 %v134_v13  ;;  %234 = vmatpush.msra.mxu3 %v134_v13 }
  0x18   :  { %152 = vmatpush.msra.mxu1 %v133_v14 }
  0x19   :  { %235 = vmatpush.msra.mxu2 %v133_v14  ;;  %236 = vmatpush.msra.mxu3 %v133_v14 }
  0x1a   :  { %215 = vmatmul.msk.f32.gmra.mxu0 %vm51_vm0, %v39_v4  ;;  %153 = vmatpush.msra.mxu1 %v132_v16 }
  0x1b   :  { %237 = vmatpush.msra.mxu2 %v132_v16  ;;  %238 = vmatpush.msra.mxu3 %v132_v16 }
  0x1c   :  { %154 = vmatpush.msra.mxu1 %v131_v17 }
  0x1d   :  { %239 = vmatpush.msra.mxu2 %v131_v17  ;;  %240 = vmatpush.msra.mxu3 %v131_v17 }
  0x1e   :  { %155 = vmatpush.msra.mxu1 %v130_v18 }
  0x1f   :  { %241 = vmatpush.msra.mxu2 %v130_v18  ;;  %242 = vmatpush.msra.mxu3 %v130_v18 }
  0x20   :  { %156 = vmatpush.msra.mxu1 %v129_v19 }
  0x21   :  { %243 = vmatpush.msra.mxu2 %v129_v19  ;;  %244 = vmatpush.msra.mxu3 %v129_v19 }
  0x22   :  { %216 = vmatmul.msk.f32.gmra.mxu0 %vm51_vm0, %v40_v5  ;;  %157 = vmatpush.msra.mxu1 %v128_v21 }
  0x23   :  { %245 = vmatpush.msra.mxu2 %v128_v21  ;;  %246 = vmatpush.msra.mxu3 %v128_v21 }
  0x24   :  { %158 = vmatpush.msra.mxu1 %v127_v23 }
  0x25   :  { %247 = vmatpush.msra.mxu2 %v127_v23  ;;  %248 = vmatpush.msra.mxu3 %v127_v23 }
  0x26   :  { %159 = vmatpush.msra.mxu1 %v126_v24 }
  0x27   :  { %249 = vmatpush.msra.mxu2 %v126_v24  ;;  %250 = vmatpush.msra.mxu3 %v126_v24 }
  0x28   :  { %160 = vmatpush.msra.mxu1 %v125_v25 }
  0x29   :  { %251 = vmatpush.msra.mxu2 %v125_v25  ;;  %252 = vmatpush.msra.mxu3 %v125_v25 }
  0x2a   :  { %217 = vmatmul.msk.f32.gmra.mxu0 %vm51_vm0, %v41_v10 }
  0x32   :  { %218 = vmatmul.msk.f32.gmra.mxu0 %vm51_vm0, %v42_v15 }
  0x3a   :  { %219 = vmatmul.msk.f32.gmra.mxu0 %vm51_vm0, %v43_v20 }
  0x42   :  { %220 = vmatmul.msk.f32.gmra.mxu0 %vm51_vm0, %v44_v22 }
  0x87   :  { %v93_v27 = vpop.f32.mrf.mxu0 }
  0x88   :  { %v94_v28 = vadd.f32 %v257_v26, %v93_v27 }
  0x8a   :  { %v117_v29 = vmax.f32 %v94_v28, 0.0 }
  0x8c   :  { %161 = vmatmul.f32.vlgmr.msra.gmra.mxu1 %v117_v29 }
  0x8f   :  { %v96_v30 = vpop.f32.mrf.mxu0 }
  0x90   :  { %v97_v31 = vadd.f32 %v257_v26, %v96_v30 }
  0x92   :  { %v118_v32 = vmax.f32 %v97_v31, 0.0 }
  0x94   :  { %164 = vmatmul.f32.gmra.mxu1 %v118_v32 }
  0x97   :  { %v99_v33 = vpop.f32.mrf.mxu0 }
  0x98   :  { %v100_v34 = vadd.f32 %v257_v26, %v99_v33 }
  0x9a   :  { %v119_v35 = vmax.f32 %v100_v34, 0.0 }
  0x9c   :  { %167 = vmatmul.f32.gmra.mxu1 %v119_v35 }
  0x9f   :  { %v102_v36 = vpop.f32.mrf.mxu0 }
  0xa0   :  { %v103_v37 = vadd.f32 %v257_v26, %v102_v36 }
  0xa2   :  { %v120_v38 = vmax.f32 %v103_v37, 0.0 }
  0xa4   :  { %170 = vmatmul.f32.vlgmr.msra.gmra.mxu2 %v120_v38 }
  0xa7   :  { %v105_v39 = vpop.f32.mrf.mxu0 }
  0xa8   :  { %v106_v40 = vadd.f32 %v257_v26, %v105_v39 }
  0xaa   :  { %v121_v41 = vmax.f32 %v106_v40, 0.0 }
  0xac   :  { %173 = vmatmul.f32.vlgmr.msra.gmra.mxu3 %v121_v41 }
  0xaf   :  { %v108_v42 = vpop.f32.mrf.mxu0 }
  0xb0   :  { %v109_v43 = vadd.f32 %v257_v26, %v108_v42 }
  0xb2   :  { %v122_v44 = vmax.f32 %v109_v43, 0.0 }
  0xb4   :  { %176 = vmatmul.f32.gmra.mxu3 %v122_v44 }
  0xb7   :  { %v111_v45 = vpop.f32.mrf.mxu0 }
  0xb8   :  { %v112_v46 = vadd.f32 %v257_v26, %v111_v45 }
  0xba   :  { %v123_v47 = vmax.f32 %v112_v46, 0.0 }
  0xbc   :  { %179 = vmatmul.f32.gmra.mxu3 %v123_v47 }
  0xbf   :  { %v114_v48 = vpop.f32.mrf.mxu0 }
  0xc0   :  { %v115_v49 = vadd.f32 %v257_v26, %v114_v48 }
  0xc2   :  { %v124_v50 = vmax.f32 %v115_v49, 0.0 }
  0xc4   :  { %182 = vmatmul.f32.gmra.mxu3 %v124_v50 }
 0x109   :  { %v162_v52 = vpop.f32.mrf.mxu1 }
 0x10a   :  { %v163_v53 = vadd.f32 %v258_v51, %v162_v52 }
 0x10c   :  { %186 = vst [vmem:[#allocation5] sm:$0xff] %v163_v53 }
 0x111   :  { %v165_v54 = vpop.f32.mrf.mxu1 }
 0x112   :  { %v166_v55 = vadd.f32 %v258_v51, %v165_v54 }
 0x114   :  { %187 = vst [vmem:[#allocation5 + $0x8] sm:$0xff] %v166_v55 }
 0x119   :  { %v168_v56 = vpop.f32.mrf.mxu1 }
 0x11a   :  { %v169_v57 = vadd.f32 %v258_v51, %v168_v56 }
 0x11c   :  { %188 = vst [vmem:[#allocation5 + $0x10] sm:$0xff] %v169_v57 }
 0x127   :  { %v171_v58 = vpop.f32.mrf.mxu2 }
 0x128   :  { %v172_v59 = vadd.f32 %v258_v51, %v171_v58 }
 0x12a   :  { %189 = vst [vmem:[#allocation5 + $0x18] sm:$0xff] %v172_v59 }
 0x12f   :  { %v174_v60 = vpop.f32.mrf.mxu3 }
 0x130   :  { %v175_v61 = vadd.f32 %v258_v51, %v174_v60 }
 0x132   :  { %190 = vst [vmem:[#allocation5 + $0x20] sm:$0xff] %v175_v61 }
 0x137   :  { %v177_v62 = vpop.f32.mrf.mxu3 }
 0x138   :  { %v178_v63 = vadd.f32 %v258_v51, %v177_v62 }
 0x13a   :  { %191 = vst [vmem:[#allocation5 + $0x28] sm:$0xff] %v178_v63 }
 0x13f   :  { %v180_v0 = vpop.f32.mrf.mxu3 }
 0x140   :  { %v181_v1 = vadd.f32 %v258_v51, %v180_v0 }
 0x142   :  { %192 = vst [vmem:[#allocation5 + $0x30] sm:$0xff] %v181_v1 }
 0x147   :  { %v183_v2 = vpop.f32.mrf.mxu3 }
 0x148   :  { %v184_v3 = vadd.f32 %v258_v51, %v183_v2 }
 0x14a   :  { %193 = vst [vmem:[#allocation5 + $0x38] sm:$0xff] %v184_v3 }
 0x14b   :  { %206 = dma.vmem_to_hbm [thread:$0]  %s199_s20, 1024, %s201_s25, [#allocation4], %s312_s23, %s312_s23, %s313_s24  }
 0x14c   :  { %309 = dma.done.wait [#allocation4], 1024  }
 0x14d   :  { %310 = vsyncadd [#allocation4], 4294966272 }
 0x14e   :  { %211 = vsyncpa [#allocation3], 1 }
 0x14f   :  { %212 = vsyncpa [#allocation4], 1 }

</bundles_post_ra>
